<compile_context>
chip_gen: v7x
topology: tpu7x:2x2x1
jax: 0.10.0
libtpu: 0.0.40
codegen_flags: <defaults>
</compile_context>

<pallas_src>
import functools

import jax
import jax.numpy as jnp
from jax.experimental import pallas as pl
from jax.experimental.pallas import tpu as pltpu


def _edge_decoder_kernel(edge_ref, zt_ref, w1t_ref, b1_ref, w2_ref, b2_ref,
                         o_ref, *, apply_sigmoid, n_nodes):
    """One edge tile, feature-on-sublane / edge-on-lane layout.

    edge_ref: [2, TE]   int32     row 0 = src ids, row 1 = dst ids
    zt_ref:   [Cin, N]  f32/bf16  node embeddings (transposed, VMEM-resident)
    w1t_ref:  [H, Cin]  f32/bf16  layer-0 weight (transposed, resident)
    b1_ref:   [H, 1]    f32       layer-0 bias column
    w2_ref:   [H, 1]    f32       layer-1 weight column (Cout == 1)
    b2_ref:   (1,)      f32       layer-1 bias, SMEM scalar
    o_ref:    [1, TE]   f32       lane-dense output tile
    """
    te = o_ref.shape[1]

    idx = edge_ref[...]                                   # [2, TE] int32
    src = idx[0:1, :]                                     # [1, TE]
    dst = idx[1:2, :]                                     # [1, TE]

    # Fused gather: one-hot selectors built on the fly, endpoint embeddings
    # pulled from the VMEM-resident z^T with two small MXU matmuls.
    node_ids = jax.lax.broadcasted_iota(jnp.int32, (n_nodes, te), 0)  # [N, TE]
    onehot_a = (node_ids == src).astype(jnp.float32)      # [N, TE]
    onehot_b = (node_ids == dst).astype(jnp.float32)      # [N, TE]

    # All math in f32 regardless of the HBM storage dtype (v5e has no bf16 VPU).
    zt = zt_ref[...].astype(jnp.float32)                  # [Cin, N]
    za = jnp.dot(zt, onehot_a, preferred_element_type=jnp.float32)   # [Cin, TE]
    zb = jnp.dot(zt, onehot_b, preferred_element_type=jnp.float32)   # [Cin, TE]

    x = za * zb                                           # Hadamard, [Cin, TE]
    # Dropout is identity at inference time (nn.Dropout in eval mode).

    # Layer 0: Linear + ReLU (MXU, f32 accumulation), stays edge-on-lane.
    w1t = w1t_ref[...].astype(jnp.float32)                # [H, Cin]
    h = jnp.dot(w1t, x, preferred_element_type=jnp.float32)          # [H, TE]
    h = jnp.maximum(h + b1_ref[...], 0.0)                 # ReLU

    # Layer 1 (Cout == 1): VPU multiply + sublane reduction -> lane-dense [1,TE]
    # (keeps the tiny [*,1] matmul off the MXU and the store unmasked).
    y = jnp.sum(h * w2_ref[...], axis=0, keepdims=True)   # [1, TE]
    y = y + b2_ref[0]
    if apply_sigmoid:
        y = jax.nn.sigmoid(y)
    o_ref[...] = y.astype(o_ref.dtype)


def edge_decoder_forward(z, edge, params, *, sigmoid=True, tile_e=2048,
                         storage_dtype=None):
    """Pallas implementation of EdgeDecoder.forward(z, edge).

    z:       [N, Cin]  node embeddings
    edge:    [2, E]    integer edge index
    params:  dict with w1 [Cin, H], b1 [H], w2 [H, 1], b2 [1]
    tile_e:  edges per grid step; multiple of 128 (512-4096 recommended;
             keep ~<=16K on v7x to leave VMEM headroom).
    storage_dtype: optional narrow dtype (jnp.bfloat16 on v6e/v7x) for the HBM
             copies of z / w1; all in-kernel math is f32 either way.
    returns  [E, 1] float32
    """
    w1, b1, w2, b2 = params["w1"], params["b1"], params["w2"], params["b2"]
    cin, hidden = w1.shape
    cout = w2.shape[1]
    assert cout == 1, "lane-dense epilogue assumes Cout == 1 (EdgeDecoder default)"
    n = z.shape[0]
    e = edge.shape[1]
    assert tile_e % 128 == 0, "tile_e must be a multiple of 128 (TPU lanes)"

    # Pad E up to a tile multiple with node index 0 (always valid); the padded
    # tail of the output is sliced off below.
    e_pad = pl.cdiv(e, tile_e) * tile_e
    num_tiles = e_pad // tile_e
    edge_i32 = edge.astype(jnp.int32)
    if e_pad != e:
        edge_i32 = jnp.pad(edge_i32, ((0, 0), (0, e_pad - e)))

    sdt = storage_dtype if storage_dtype is not None else z.dtype
    zt = z.astype(sdt).T                                  # [Cin, N]
    w1t = w1.astype(sdt).T                                # [H, Cin]
    b1c = b1.astype(jnp.float32).reshape(hidden, 1)       # [H, 1]
    w2c = w2.astype(jnp.float32).reshape(hidden, 1)       # [H, 1]
    b2s = b2.astype(jnp.float32).reshape(1)               # (1,) SMEM scalar

    kernel = functools.partial(_edge_decoder_kernel,
                               apply_sigmoid=sigmoid, n_nodes=n)

    itemsize = jnp.dtype(sdt).itemsize
    cost = pl.CostEstimate(
        flops=e_pad * (2 * cin * hidden            # layer-0 matmul
                       + 2 * hidden * cout          # layer-1 reduction
                       + 4 * n * cin                # two one-hot gather matmuls
                       + cin),                      # Hadamard
        transcendentals=e_pad if sigmoid else 0,
        bytes_accessed=(n * cin * itemsize          # z (read once, resident)
                        + 2 * e_pad * 4             # edge ids
                        + cin * hidden * itemsize   # w1
                        + (hidden + hidden + 1) * 4 # b1, w2, b2
                        + e_pad * 4),               # output
    )

    out = pl.pallas_call(
        kernel,
        out_shape=jax.ShapeDtypeStruct((1, e_pad), jnp.float32),
        grid_spec=pltpu.PrefetchScalarGridSpec(
            num_scalar_prefetch=0,
            grid=(num_tiles,),
            in_specs=[
                pl.BlockSpec((2, tile_e), lambda i: (0, i)),        # edge tile
                pl.BlockSpec((cin, n), lambda i: (0, 0)),           # z^T  (resident)
                pl.BlockSpec((hidden, cin), lambda i: (0, 0)),      # w1^T (resident)
                pl.BlockSpec((hidden, 1), lambda i: (0, 0)),        # b1 column
                pl.BlockSpec((hidden, 1), lambda i: (0, 0)),        # w2 column
                pl.BlockSpec(memory_space=pltpu.MemorySpace.SMEM),  # b2 scalar
            ],
            out_specs=pl.BlockSpec((1, tile_e), lambda i: (0, i)),  # lane-dense
        ),
        compiler_params=pltpu.CompilerParams(
            dimension_semantics=("parallel",),       # megacore split on v7x
            vmem_limit_bytes=32 * 1024 * 1024,       # headroom on v7x (64 MiB)
        ),
        cost_estimate=cost,
    )(edge_i32, zt, w1t, b1c, w2c, b2s)

    return out[0, :e].reshape(e, 1)


def _reference_forward(z, edge, params, sigmoid=True):
    x = z[edge[0]] * z[edge[1]]
    h = jnp.maximum(x @ params["w1"] + params["b1"], 0.0)
    y = h @ params["w2"] + params["b2"]
    return jax.nn.sigmoid(y) if sigmoid else y


if __name__ == "__main__":
    # Small shapes consistent with the module: EdgeDecoder(in=32, hidden=32, out=1).
    # E is deliberately NOT a multiple of the tile so the padding path is used.
    N, CIN, HID, COUT, E = 64, 32, 32, 1, 2000
    TILE_E = 512        # small demo tile (>=512 per review); default is 2048

    key = jax.random.PRNGKey(0)
    kz, ke, k1, k2, k3, k4 = jax.random.split(key, 6)

    z = jax.random.normal(kz, (N, CIN), dtype=jnp.float32)
    edge = jax.random.randint(ke, (2, E), 0, N, dtype=jnp.int32)

    params = {
        "w1": jax.random.normal(k1, (CIN, HID), dtype=jnp.float32) * 0.1,
        "b1": jax.random.normal(k2, (HID,), dtype=jnp.float32) * 0.01,
        "w2": jax.random.normal(k3, (HID, COUT), dtype=jnp.float32) * 0.1,
        "b2": jax.random.normal(k4, (COUT,), dtype=jnp.float32) * 0.01,
    }

    ref = _reference_forward(z, edge, params, sigmoid=True)

    # f32 storage path: tight check against the pure-JAX reference.
    out = edge_decoder_forward(z, edge, params, sigmoid=True, tile_e=TILE_E)
    out = jax.block_until_ready(out)
    assert out.shape == (E, COUT)
    assert jnp.allclose(out, ref, atol=1e-4, rtol=1e-4), "f32 mismatch vs reference"

    # bf16 storage path (recommended on v6e/v7x to halve HBM traffic); in-kernel
    # math is still f32, only z / w1 are stored narrow -> looser tolerance.
    out_bf16 = edge_decoder_forward(z, edge, params, sigmoid=True,
                                    tile_e=TILE_E, storage_dtype=jnp.bfloat16)
    out_bf16 = jax.block_until_ready(out_bf16)
    assert out_bf16.shape == (E, COUT)
    assert jnp.allclose(out_bf16, ref, atol=2e-2, rtol=2e-2), "bf16 mismatch vs reference"

    print("KERNEL_OK")
</pallas_src>

<mosaic_0001>
module attributes {stable_mosaic.version = 11 : i64} {
  func.func @_edge_decoder_kernel(%arg0: i32, %arg1: memref<2x512xi32, #tpu.memory_space<vmem>>, %arg2: memref<32x64xf32, #tpu.memory_space<vmem>>, %arg3: memref<32x32xf32, #tpu.memory_space<vmem>>, %arg4: memref<32x1xf32, #tpu.memory_space<vmem>>, %arg5: memref<32x1xf32, #tpu.memory_space<vmem>>, %arg6: memref<1xf32, #tpu.memory_space<smem>>, %arg7: memref<1x512xf32, #tpu.memory_space<vmem>>) attributes {dimension_semantics = [#tpu.dimension_semantics<parallel>], iteration_bounds = array<i64: 4>, scalar_prefetch = 0 : i64, scratch_operands = 0 : i64, tpu.core_type = #tpu.core_type<tc>, window_params = [{transform_indices = @transform_0, window_bounds = array<i64: 2, 512>}, {pipeline_mode = #tpu.pipeline_mode<synchronous>, transform_indices = @transform_1, window_bounds = array<i64: 32, 64>}, {pipeline_mode = #tpu.pipeline_mode<synchronous>, transform_indices = @transform_2, window_bounds = array<i64: 32, 32>}, {pipeline_mode = #tpu.pipeline_mode<synchronous>, transform_indices = @transform_3, window_bounds = array<i64: 32, 1>}, {pipeline_mode = #tpu.pipeline_mode<synchronous>, transform_indices = @transform_4, window_bounds = array<i64: 32, 1>}, {transform_indices = @transform_5, window_bounds = array<i64: 1>}, {transform_indices = @transform_6, window_bounds = array<i64: 1, 512>}]} {
    %c0 = arith.constant 0 : index
    %c0_0 = arith.constant 0 : index
    %0 = vector.load %arg1[%c0, %c0_0] : memref<2x512xi32, #tpu.memory_space<vmem>>, vector<2x512xi32>
    %1 = vector.extract_strided_slice %0 {offsets = [0, 0], sizes = [1, 512], strides = [1, 1]} : vector<2x512xi32> to vector<1x512xi32>
    %2 = vector.extract_strided_slice %0 {offsets = [1, 0], sizes = [1, 512], strides = [1, 1]} : vector<2x512xi32> to vector<1x512xi32>
    %3 = tpu.iota {dimensions = array<i32: 0>} : vector<64x512xi32>
    %4 = vector.broadcast %1 : vector<1x512xi32> to vector<64x512xi32>
    %5 = arith.cmpi eq, %3, %4 : vector<64x512xi32>
    %6 = arith.extui %5 : vector<64x512xi1> to vector<64x512xi32>
    %7 = arith.sitofp %6 : vector<64x512xi32> to vector<64x512xf32>
    %8 = vector.broadcast %2 : vector<1x512xi32> to vector<64x512xi32>
    %9 = arith.cmpi eq, %3, %8 : vector<64x512xi32>
    %10 = arith.extui %9 : vector<64x512xi1> to vector<64x512xi32>
    %11 = arith.sitofp %10 : vector<64x512xi32> to vector<64x512xf32>
    %c0_1 = arith.constant 0 : index
    %c0_2 = arith.constant 0 : index
    %12 = vector.load %arg2[%c0_1, %c0_2] : memref<32x64xf32, #tpu.memory_space<vmem>>, vector<32x64xf32>
    %cst = arith.constant dense<0.000000e+00> : vector<32x512xf32>
    %13 = tpu.matmul %12, %7, %cst {dimension_numbers = #tpu.dot_dimension_numbers<[1], [0], [0], [1], [0, 0, 1, 1], [], []>} : vector<32x64xf32>, vector<64x512xf32>, vector<32x512xf32> -> vector<32x512xf32>
    %cst_3 = arith.constant dense<0.000000e+00> : vector<32x512xf32>
    %14 = tpu.matmul %12, %11, %cst_3 {dimension_numbers = #tpu.dot_dimension_numbers<[1], [0], [0], [1], [0, 0, 1, 1], [], []>} : vector<32x64xf32>, vector<64x512xf32>, vector<32x512xf32> -> vector<32x512xf32>
    %15 = arith.mulf %13, %14 : vector<32x512xf32>
    %c0_4 = arith.constant 0 : index
    %c0_5 = arith.constant 0 : index
    %16 = vector.load %arg3[%c0_4, %c0_5] : memref<32x32xf32, #tpu.memory_space<vmem>>, vector<32x32xf32>
    %cst_6 = arith.constant dense<0.000000e+00> : vector<32x512xf32>
    %17 = tpu.matmul %16, %15, %cst_6 {dimension_numbers = #tpu.dot_dimension_numbers<[1], [0], [0], [1], [0, 0, 1, 1], [], []>} : vector<32x32xf32>, vector<32x512xf32>, vector<32x512xf32> -> vector<32x512xf32>
    %c0_7 = arith.constant 0 : index
    %c0_8 = arith.constant 0 : index
    %18 = vector.load %arg4[%c0_7, %c0_8] : memref<32x1xf32, #tpu.memory_space<vmem>>, vector<32x1xf32>
    %19 = vector.broadcast %18 : vector<32x1xf32> to vector<32x512xf32>
    %20 = arith.addf %17, %19 : vector<32x512xf32>
    %cst_9 = arith.constant 0.000000e+00 : f32
    %21 = vector.broadcast %cst_9 : f32 to vector<32x512xf32>
    %22 = arith.maximumf %20, %21 : vector<32x512xf32>
    %c0_10 = arith.constant 0 : index
    %c0_11 = arith.constant 0 : index
    %23 = vector.load %arg5[%c0_10, %c0_11] : memref<32x1xf32, #tpu.memory_space<vmem>>, vector<32x1xf32>
    %24 = vector.broadcast %23 : vector<32x1xf32> to vector<32x512xf32>
    %25 = arith.mulf %22, %24 : vector<32x512xf32>
    %cst_12 = arith.constant dense<0.000000e+00> : vector<512xf32>
    %26 = vector.multi_reduction <add>, %25, %cst_12 [0] : vector<32x512xf32> to vector<512xf32>
    %27 = vector.shape_cast %26 : vector<512xf32> to vector<1x512xf32>
    %c0_13 = arith.constant 0 : index
    %28 = memref.load %arg6[%c0_13] : memref<1xf32, #tpu.memory_space<smem>>
    %29 = vector.broadcast %28 : f32 to vector<1x512xf32>
    %30 = arith.addf %27, %29 : vector<1x512xf32>
    %31 = arith.negf %30 : vector<1x512xf32>
    %32 = math.exp %31 : vector<1x512xf32>
    %cst_14 = arith.constant 1.000000e+00 : f32
    %33 = vector.broadcast %cst_14 : f32 to vector<1x512xf32>
    %34 = arith.addf %33, %32 : vector<1x512xf32>
    %35 = arith.divf %33, %34 : vector<1x512xf32>
    %c0_15 = arith.constant 0 : index
    %c0_16 = arith.constant 0 : index
    %36 = vector.load %arg7[%c0_15, %c0_16] : memref<1x512xf32, #tpu.memory_space<vmem>>, vector<1x512xf32>
    tpu.vector_store %arg7[%c0_15, %c0_16], %35 {strides = array<i32>} : memref<1x512xf32, #tpu.memory_space<vmem>>, vector<1x512xf32>,
    return
  }
  func.func @transform_0(%arg0: i32) -> (i32, i32) {
    %c0_i32 = arith.constant 0 : i32
    %c0_i32_0 = arith.constant 0 : i32
    return %c0_i32, %arg0 : i32, i32
  }
  func.func @transform_1(%arg0: i32) -> (i32, i32) {
    %c0_i32 = arith.constant 0 : i32
    %c0_i32_0 = arith.constant 0 : i32
    %c0_i32_1 = arith.constant 0 : i32
    return %c0_i32, %c0_i32_0 : i32, i32
  }
  func.func @transform_2(%arg0: i32) -> (i32, i32) {
    %c0_i32 = arith.constant 0 : i32
    %c0_i32_0 = arith.constant 0 : i32
    %c0_i32_1 = arith.constant 0 : i32
    return %c0_i32, %c0_i32_0 : i32, i32
  }
  func.func @transform_3(%arg0: i32) -> (i32, i32) {
    %c0_i32 = arith.constant 0 : i32
    %c0_i32_0 = arith.constant 0 : i32
    %c0_i32_1 = arith.constant 0 : i32
    return %c0_i32, %c0_i32_0 : i32, i32
  }
  func.func @transform_4(%arg0: i32) -> (i32, i32) {
    %c0_i32 = arith.constant 0 : i32
    %c0_i32_0 = arith.constant 0 : i32
    %c0_i32_1 = arith.constant 0 : i32
    return %c0_i32, %c0_i32_0 : i32, i32
  }
  func.func @transform_5(%arg0: i32) -> i32 {
    %c0_i32 = arith.constant 0 : i32
    %c0_i32_0 = arith.constant 0 : i32
    return %c0_i32 : i32
  }
  func.func @transform_6(%arg0: i32) -> (i32, i32) {
    %c0_i32 = arith.constant 0 : i32
    %c0_i32_0 = arith.constant 0 : i32
    return %c0_i32, %arg0 : i32, i32
  }
}

</mosaic_0001>

<bundles_post_ra>
// kernel: tpu_custom_call.1
= control target key start
LH: loop header
LB: loop body
LE: loop exit
PB: predicated region body
PF: predicated region fallthrough
CT: control target
= control target key end

     0   :  { %s2344_s0 = inlined_call_operand.vmem [shape: s32[2,2048], index: 0, kind: input, shape index: {}]   ;;  %s2345_s1 = inlined_call_operand.vmem [shape: f32[32,64], index: 1, kind: input, shape index: {}]   ;;  %s2346_s2 = inlined_call_operand.hbm [shape: f32[32,32], index: 2, kind: input, shape index: {}]   ;;  %s2347_s3 = inlined_call_operand.vmem [shape: f32[32,1], index: 3, kind: input, shape index: {}]   ;;  %s2348_s4 = inlined_call_operand.vmem [shape: f32[32,1], index: 4, kind: input, shape index: {}]   ;;  %s2349_s5 = inlined_call_operand.<no memory space> [shape: f32[1], index: 5, kind: input, shape index: {}]   ;;  %s2350_s6 = inlined_call_operand.hbm [shape: f32[1,2048], index: 6, kind: output, shape index: {}]  }
   0x1   :  { %11 = sst [smem:[#allocation2]] %s2349_s5 }
   0x2   :  { %12 = vsyncpa [#allocation4], 0 }
   0x3   :  { %13 = vsyncpa [#allocation5], 0 }
   0x4   :  { %15 = vsyncpa [#allocation5 + $0x1], 0  ;;  %s1852_s23 = smov 0   ;;  %s1854_s24 = smov 0  }
   0x5   :  { %s1856_s25 = smov 0   ;;  %s1858_s26 = smov 0  }
   0x6 LB: > { %s1873_s5 = sadd.s32 4294967295, %s1804_s26   ;;  %s1385_s27 = sadd.s32 4294967294, %s1804_s26   ;;  %s1804_s26 = sphi %s1858_s26, %s2366_s26   ;;  %s1800_s25 = sphi %s1856_s25, %s2365_s25   ;;  %s1796_s24 = sphi %s1854_s24, %s2364_s24   ;;  %s1792_s23 = sphi %s1852_s23, %s2363_s23  }
   0x7   : > { %s1877_s28 = sadd.s32 1, %s1804_s26   ;;  %s159_s29 = sadd.s32 1, %s1800_s25 }
   0x8   : > { %s156_s30 = ssub.s32 %s1804_s26, %s1877_s28  ;;  %p169_p0 = scmp.ne.s32.totalorder %s1800_s25, %s1796_s24 }
   0x9   : > { %p157_p1 = scmp.eq.s32.totalorder %s156_s30, 0  ;;  %p170_p2 = scmp.eq.s32.totalorder %s1873_s5, 3 }
   0xa   : > { %p175_p3 = scmp.ne.s32.totalorder %s1796_s24, %s1792_s23  ;;  %p176_p4 = scmp.eq.s32.totalorder %s1385_s27, 3 }
   0xb   : > { %s1888_s7 = scalar_select %p157_p1, %s1800_s25, %s159_s29  }
   0xc   : > { %p1890_p5 = por %p170_p2, %p169_p0  ;;  %p1894_p6 = por %p176_p4, %p175_p3 }
   0xd   : > { %p1386_p7 = scmp.ge.s32.totalorder %s1804_s26, 1  ;;  %p183_p8 = scmp.lt.s32.totalorder %s1804_s26, 5 }
   0xe   : > { %s2354_s8 = scalar_select %p1890_p5, 1, 0 }
   0xf   : > { %s2355_s9 = scalar_select %p1894_p6, 1, 0 }
  0x10   : > { %p2351_p9 = scmp.eq.s32.totalorder %s1873_s5, 0  ;;  %p1901_p10 = pnand %p1386_p7, %p183_p8 }
  0x11   : > { %s1806_s11 = smov [#allocation3]   ;;  %s1710_s16 = scalar_lea.hbm %s2346_s2, 512 }
  0x12   : > { %s2356_s10 = scalar_select %p1901_p10, 1, 0 }
  0x13   : > { %s198_s12 = sshll.u32 %s1806_s11, 4  ;;  %p1642_p11 = pneg %p1901_p10  ;;  %s199_s12 = int_to_ptr.vmem [resolvable:$true] %s198_s12 }
  0x14   : > { %p1711_p13 = scmp.ne.s32.totalorder %s2346_s2, %s1710_s16  ;;  %p1717_p3 = scmp.lt.u32.totalorder %s1710_s16, %s2346_s2 }
  0x15   : > { %p1909_p12 = pnand %p2351_p9, %p1642_p11 }
  0x17   : > { %p1712_p0 = pneg %p1909_p12 }
  0x19   : > { %p1713_p1 = pnand %p1712_p0, %p1711_p13 }
  0x1b   : > { %p1714_p2 = pneg %p1713_p1 }
  0x1d   : > { %p1719_p4 = pnand %p1717_p3, %p1714_p2 }
  0x1f   : > { %1722 = shalt.err (!%p1719_p4)
}
  0x20   : > { %s1723_s21 = scalar_lea.vmem %s199_s12, 512  ;;  %p1731_p9 = scmp.lt.s32.totalorder %s199_s12, %s199_s12 }
  0x21   : > { %p1724_p7 = scmp.ne.s32.totalorder %s199_s12, %s1723_s21  ;;  %p1732_p6 = scmp.lt.s32.totalorder %s1723_s21, %s1723_s21 }
  0x23   : > { %p1726_p8 = pnand %p1724_p7, %p1712_p0  ;;  %p1733_p5 = por %p1732_p6, %p1731_p9 }
  0x25   : > { %p1727_p11 = pneg %p1726_p8 }
  0x27   : > { %p1734_p10 = pnand %p1733_p5, %p1727_p11 }
  0x29   : > { %1737 = shalt.err (!%p1734_p10)
}
  0x2a   : > { %s1807_s22 = smov 128   ;;  %s1808_s27 = smov 8  }
  0x2b   : > { %1645 = dma.hbm_to_vmem [thread:$0]  (!%p1909_p12), %s2346_s2, 512, %s199_s12, [#allocation4], %s1807_s22, %s1807_s22, %s1808_s27  }
  0x2c   : > { %p2358_p13 = scmp.ne.s32.totalorder %s2356_s10, 0 }
  0x2d   : > { %p2359_p1 = scmp.eq.s32.totalorder (!%p2358_p13), %s1873_s5, 0 }
  0x2e   : > { %232 = sbr.rel (%p2358_p13) target bundleno = 630 (0x276), region = 44 }
  0x35   : > { %1783 = dma.done.wait (%p2359_p1), [#allocation4], 512   ;;  %p2360_p0 = pmov %p2359_p1 }
  0x36   : > { %s1392_s11 = sshll.u32 %s1873_s5, 2  ;;  %v270_v0 = vlaneseq  ;;  %v1809_v1 = vmov 0.0   ;;  %v1810_v20 = vmov 1.0|1.0   ;;  %v2113_v36 = vld [vmem:[%s2345_s1] sm:$0xff]  ;;  %v2142_v37 = vld [vmem:[%s2345_s1 + $0x8] sm:$0xff] }
  0x37   : > { %1785 = vsyncadd (%p2360_p0), [#allocation4], 4294966784  ;;  %p263_p5 = scmp.lt.s32.totalorder %s1392_s11, 15  ;;  %616 = vmatprep.mubr.f32.mxu0 %v1809_v1  ;;  %705 = vmatprep.mubr.f32.mxu1 %v1809_v1  ;;  %v537_v38 = vld [vmem:[%s2345_s1 + $0x10] sm:$0xff]  ;;  %v538_v39 = vld [vmem:[%s2345_s1 + $0x18] sm:$0xff]  ;;  %v1811_v42 = vmov 0  }
  0x38   : > { %v1939_v2 = vshrl.u32 %v270_v0, 7  ;;  %v928_v40 = vld [vmem:[%s2347_s3] sm:$0xff]  ;;  %v930_v41 = vld [vmem:[%s2347_s3 + $0x10] sm:$0xff]  ;;  %1692 = vset.pattern.permute.xlu0 %v1811_v42  ;;  %1693 = vset.pattern.permute.xlu1 %v1811_v42  ;;  %v929_v43 = vld [vmem:[%s2347_s3 + $0x8] sm:$0xff]  ;;  %s1235_s27 = sld [smem:[#allocation2]]  ;;  %s259_s29 = sand.u32 1, %s1796_s24  }
  0x39   : > { %s2368_s11 = smov (!%p263_p5, %s1392_s11), 15  ;;  %934 = vperm.xlu0 %1692, %v928_v40   ;;  %944 = vperm.xlu1 %1693, %v930_v41   ;;  %v931_v44 = vld [vmem:[%s2347_s3 + $0x18] sm:$0xff]  ;;  %v1159_v45 = vld [vmem:[%s2348_s4] sm:$0xff]  ;;  %v1160_v46 = vld [vmem:[%s2348_s4 + $0x8] sm:$0xff]  ;;  %s1391_s30 = sshll.u32 %s259_s29, 2 }
  0x3a   : > { %v281_v3 = vsub.s32 0, %v1939_v2  ;;  %v285_v4 = vsub.s32 2, %v1939_v2  ;;  %v293_v5 = vsub.s32 6, %v1939_v2  ;;  %s1393_s10 = sshll.u32 %s2368_s11, 1  ;;  %v289_v6 = vsub.s32 4, %v1939_v2  ;;  %v1161_v47 = vld [vmem:[%s2348_s4 + $0x10] sm:$0xff] }
  0x3b   : > { %s266_s14 = scalar_lea.vmem %s2344_s0, %s1393_s10  ;;  %v1951_v8 = vadd.s32 8, %v1939_v2  ;;  %v1958_v13 = vadd.s32 16, %v1939_v2  ;;  %v1961_v14 = vadd.s32 24, %v1939_v2  ;;  %v1972_v19 = vadd.s32 32, %v1939_v2  ;;  %v1162_v48 = vld [vmem:[%s2348_s4 + $0x18] sm:$0xff]  ;;  %s1555_s11 = sshll.u32 %s1873_s5, 6 }
  0x3c   : > { %v1948_v7 = vld [vmem:[%s266_s14] sm:$0xff]  ;;  %v1996_v21 = vadd.s32 40, %v1939_v2  ;;  %v413_v22 = vsub.s32 3, %v1939_v2  ;;  %v421_v23 = vsub.s32 7, %v1939_v2  ;;  %v409_v24 = vsub.s32 1, %v1939_v2  ;;  %s261_s10 = scalar_lea.vmem [#allocation6], %s1391_s30  ;;  %s2302_s15 = scalar_lea.hbm %s2350_s6, %s1555_s11 }
  0x3d   : > { %v286_v9 = vrot.slane %v1948_v7, %v285_v4  ;;  %v294_v10 = vrot.slane %v1948_v7, %v293_v5  ;;  %v282_v11 = vrot.slane %v1948_v7, %v281_v3  ;;  %v290_v12 = vrot.slane %v1948_v7, %v289_v6  ;;  %939 = vperm.xlu0 %1692, %v929_v43   ;;  %s1314_s12 = sshll.u32 %s261_s10, 4  ;;  %s1300_s16 = scalar_lea.sflag [#allocation5], %s259_s29  ;;  %s2304_s12 = int_to_ptr.vmem [resolvable:$true] %s1314_s12 }
  0x3e   : > { %v2023_v25 = vadd.s32 48, %v1939_v2  ;;  %v417_v26 = vsub.s32 5, %v1939_v2  ;;  %v2035_v27 = vadd.s32 56, %v1939_v2  ;;  %v414_v28 = vrot.slane %v1948_v7, %v413_v22  ;;  %949 = vperm.xlu1 %1693, %v931_v44   ;;  %v924_v44 = vld [vmem:[#allocation3] sm:$0xff]  ;;  %s1738_s17 = scalar_lea.vmem %s2304_s12, 64  ;;  %p2361_p9 = scmp.ne.s32.totalorder %s2354_s8, 0 }
  0x3f   : > { %v1963_v15 = vrot.slane %v286_v9, %v281_v3  ;;  %v1965_v16 = vrot.slane %v294_v10, %v281_v3  ;;  %v1967_v17 = vrot.slane %v282_v11, %v281_v3  ;;  %v1969_v18 = vrot.slane %v290_v12, %v281_v3  ;;  %p1739_p6 = scmp.ne.s32.totalorder %s2304_s12, %s1738_s17  ;;  %s1813_s5 = smov [#allocation6]  }
  0x40   : > { %v422_v29 = vrot.slane %v1948_v7, %v421_v23  ;;  %v410_v30 = vrot.slane %v1948_v7, %v409_v24  ;;  %v418_v31 = vrot.slane %v1948_v7, %v417_v26  ;;  %v2076_v32 = vrot.slane %v414_v28, %v409_v24  ;;  %s1742_s18 = sshll.u32 %s1813_s5, 4  ;;  %s1743_s18 = int_to_ptr.vmem [resolvable:$false] %s1742_s18 }
  0x41   : > { %vm312_vm0 = vcmp.eq.s32.totalorder %v1939_v2, %v1963_v15  ;;  %vm316_vm1 = vcmp.eq.s32.totalorder %v1951_v8, %v1963_v15  ;;  %vm314_vm2 = vcmp.eq.s32.totalorder %v1939_v2, %v1965_v16  ;;  %vm318_vm3 = vcmp.eq.s32.totalorder %v1951_v8, %v1965_v16  ;;  %1165 = vperm.xlu0 %1692, %v1159_v45   ;;  %v925_v45 = vld [vmem:[#allocation3 + $0x8] sm:$0xff]  ;;  %p1740_p10 = pnand %p1739_p6, %p2361_p9  ;;  %s1744_s19 = scalar_lea.vmem %s1743_s18, 128 }
  0x42   : > { %vm1556_vm4 = vmpackc.low %vm316_vm1, %vm312_vm0  ;;  %vm311_vm5 = vcmp.eq.s32.totalorder %v1939_v2, %v1967_v17  ;;  %vm315_vm6 = vcmp.eq.s32.totalorder %v1951_v8, %v1967_v17  ;;  %vm313_vm7 = vcmp.eq.s32.totalorder %v1939_v2, %v1969_v18  ;;  %vm317_vm8 = vcmp.eq.s32.totalorder %v1951_v8, %v1969_v18  ;;  %1170 = vperm.xlu1 %1693, %v1160_v46   ;;  %v926_v46 = vld [vmem:[#allocation3 + $0x10] sm:$0xff]  ;;  %p1745_p2 = scmp.lt.s32.totalorder %s2304_s12, %s1743_s18  ;;  %p1746_p3 = scmp.lt.s32.totalorder %s1744_s19, %s1738_s17 }
  0x43   : > { %1557 = vmatprep.subr.msk.bf16.mxu0 %vm1556_vm4, %v1810_v20  ;;  %vm1572_vm9 = vmpackc.low %vm318_vm3, %vm314_vm2  ;;  %vm320_vm10 = vcmp.eq.s32.totalorder %v1958_v13, %v1963_v15  ;;  %vm324_vm11 = vcmp.eq.s32.totalorder %v1961_v14, %v1963_v15  ;;  %vm322_vm13 = vcmp.eq.s32.totalorder %v1958_v13, %v1965_v16  ;;  %vm326_vm14 = vcmp.eq.s32.totalorder %v1961_v14, %v1965_v16  ;;  %p1741_p12 = pneg %p1740_p10 }
  0x44   : > { %1573 = vmatprep.subr.msk.bf16.mxu1 %vm1572_vm9, %v1810_v20  ;;  %vm1558_vm12 = vmpackc.low %vm315_vm6, %vm311_vm5  ;;  %vm319_vm0 = vcmp.eq.s32.totalorder %v1958_v13, %v1967_v17  ;;  %vm323_vm1 = vcmp.eq.s32.totalorder %v1961_v14, %v1967_v17  ;;  %vm321_vm3 = vcmp.eq.s32.totalorder %v1958_v13, %v1969_v18  ;;  %vm325_vm4 = vcmp.eq.s32.totalorder %v1961_v14, %v1969_v18  ;;  %p1747_p4 = por %p1746_p3, %p1745_p2 }
  0x45   : > { %1559 = vmatpush1.bf16.msk.msra.mxu0 %vm1558_vm12, %v1810_v20  ;;  %vm1574_vm15 = vmpackc.low %vm317_vm8, %vm313_vm7  ;;  %vm328_vm6 = vcmp.eq.s32.totalorder %v1972_v19, %v1963_v15  ;;  %vm332_vm7 = vcmp.eq.s32.totalorder %v1996_v21, %v1963_v15  ;;  %vm330_vm9 = vcmp.eq.s32.totalorder %v1972_v19, %v1965_v16  ;;  %vm327_vm12 = vcmp.eq.s32.totalorder %v1972_v19, %v1967_v17 }
  0x46   : > { %1575 = vmatpush1.bf16.msk.msra.mxu1 %vm1574_vm15, %v1810_v20  ;;  %vm1560_vm2 = vmpackc.low %vm324_vm11, %vm320_vm10  ;;  %vm334_vm10 = vcmp.eq.s32.totalorder %v1996_v21, %v1965_v16  ;;  %vm329_vm15 = vcmp.eq.s32.totalorder %v1972_v19, %v1969_v18  ;;  %v2083_v33 = vrot.slane %v422_v29, %v409_v24  ;;  %v2090_v34 = vrot.slane %v410_v30, %v409_v24  ;;  %p1748_p7 = pnand %p1747_p4, %p1741_p12 }
  0x47   : > { %1561 = vmatprep.subr.msk.bf16.mxu0 %vm1560_vm2, %v1810_v20  ;;  %vm1576_vm5 = vmpackc.low %vm326_vm14, %vm322_vm13  ;;  %vm331_vm13 = vcmp.eq.s32.totalorder %v1996_v21, %v1967_v17  ;;  %vm336_vm2 = vcmp.eq.s32.totalorder %v2023_v25, %v1963_v15  ;;  %v2097_v35 = vrot.slane %v418_v31, %v409_v24  ;;  %1175 = vperm.xlu0 %1692, %v1161_v47   ;;  %v927_v47 = vld [vmem:[#allocation3 + $0x18] sm:$0xff] }
  0x48   : > { %1577 = vmatprep.subr.msk.bf16.mxu1 %vm1576_vm5, %v1810_v20  ;;  %vm1562_vm8 = vmpackc.low %vm323_vm1, %vm319_vm0  ;;  %vm333_vm0 = vcmp.eq.s32.totalorder %v1996_v21, %v1969_v18  ;;  %vm338_vm5 = vcmp.eq.s32.totalorder %v2023_v25, %v1965_v16  ;;  %1180 = vperm.xlu1 %1693, %v1162_v48  }
  0x49   : > { %1563 = vmatpush1.bf16.msk.msra.mxu0 %vm1562_vm8, %v1810_v20  ;;  %vm1578_vm11 = vmpackc.low %vm325_vm4, %vm321_vm3  ;;  %vm340_vm3 = vcmp.eq.s32.totalorder %v2035_v27, %v1963_v15  ;;  %vm335_vm8 = vcmp.eq.s32.totalorder %v2023_v25, %v1967_v17 }
  0x4a   : > { %1579 = vmatpush1.bf16.msk.msra.mxu1 %vm1578_vm11, %v1810_v20  ;;  %vm1564_vm14 = vmpackc.low %vm332_vm7, %vm328_vm6  ;;  %vm342_vm6 = vcmp.eq.s32.totalorder %v2035_v27, %v1965_v16  ;;  %vm337_vm11 = vcmp.eq.s32.totalorder %v2023_v25, %v1969_v18 }
  0x4b   : > { %1565 = vmatprep.subr.msk.bf16.mxu0 %vm1564_vm14, %v1810_v20  ;;  %vm1580_vm1 = vmpackc.low %vm334_vm10, %vm330_vm9  ;;  %vm339_vm9 = vcmp.eq.s32.totalorder %v2035_v27, %v1967_v17  ;;  %vm440_vm14 = vcmp.eq.s32.totalorder %v1939_v2, %v2076_v32 }
  0x4c   : > { %1581 = vmatprep.subr.msk.bf16.mxu1 %vm1580_vm1, %v1810_v20  ;;  %vm1566_vm4 = vmpackc.low %vm331_vm13, %vm327_vm12  ;;  %vm341_vm12 = vcmp.eq.s32.totalorder %v2035_v27, %v1969_v18  ;;  %vm442_vm1 = vcmp.eq.s32.totalorder %v1939_v2, %v2083_v33 }
  0x4d   : > { %1567 = vmatpush1.bf16.msk.msra.mxu0 %vm1566_vm4, %v1810_v20  ;;  %vm1582_vm7 = vmpackc.low %vm333_vm0, %vm329_vm15  ;;  %vm444_vm15 = vcmp.eq.s32.totalorder %v1951_v8, %v2076_v32  ;;  %vm539_vm4 = vcmask 523264  }
  0x4e   : > { %1583 = vmatpush1.bf16.msk.msra.mxu1 %vm1582_vm7, %v1810_v20  ;;  %vm1568_vm10 = vmpackc.low %vm340_vm3, %vm336_vm2  ;;  %vm446_vm2 = vcmp.eq.s32.totalorder %v1951_v8, %v2083_v33 }
  0x4f   : > { %1569 = vmatprep.subr.msk.bf16.mxu0 %vm1568_vm10, %v1810_v20  ;;  %vm1584_vm13 = vmpackc.low %vm342_vm6, %vm338_vm5  ;;  %vm439_vm5 = vcmp.eq.s32.totalorder %v1939_v2, %v2090_v34  ;;  %vm443_vm6 = vcmp.eq.s32.totalorder %v1951_v8, %v2090_v34 }
  0x50   : > { %1585 = vmatprep.subr.msk.bf16.mxu1 %vm1584_vm13, %v1810_v20  ;;  %vm1570_vm0 = vmpackc.low %vm339_vm9, %vm335_vm8  ;;  %vm441_vm8 = vcmp.eq.s32.totalorder %v1939_v2, %v2097_v35  ;;  %vm445_vm9 = vcmp.eq.s32.totalorder %v1951_v8, %v2097_v35 }
  0x51   : > { %1571 = vmatpush1.bf16.msk.msra.mxu0 %vm1570_vm0, %v1810_v20  ;;  %vm1586_vm3 = vmpackc.low %vm341_vm12, %vm337_vm11  ;;  %vm448_vm11 = vcmp.eq.s32.totalorder %v1958_v13, %v2076_v32  ;;  %vm452_vm12 = vcmp.eq.s32.totalorder %v1961_v14, %v2076_v32 }
  0x52   : > { %1587 = vmatpush1.bf16.msk.msra.mxu1 %vm1586_vm3, %v1810_v20  ;;  %vm1588_vm7 = vmpackc.low %vm444_vm15, %vm440_vm14  ;;  %vm450_vm14 = vcmp.eq.s32.totalorder %v1958_v13, %v2083_v33  ;;  %vm454_vm15 = vcmp.eq.s32.totalorder %v1961_v14, %v2083_v33 }
  0x53   : > { %1589 = vmatprep.subr.msk.bf16.mxu0 %vm1588_vm7, %v1810_v20  ;;  %vm1604_vm10 = vmpackc.low %vm446_vm2, %vm442_vm1  ;;  %vm447_vm1 = vcmp.eq.s32.totalorder %v1958_v13, %v2090_v34  ;;  %vm451_vm2 = vcmp.eq.s32.totalorder %v1961_v14, %v2090_v34 }
  0x54   : > { %1474 = vmatmul.mubr.msk.f32.vlgmr.msra.gmra.mrb[0].mxu0 %vm539_vm4, %v2113_v36  ;;  %1605 = vmatprep.subr.msk.bf16.mxu1 %vm1604_vm10, %v1810_v20  ;;  %vm1590_vm13 = vmpackc.low %vm443_vm6, %vm439_vm5  ;;  %vm449_vm5 = vcmp.eq.s32.totalorder %v1958_v13, %v2097_v35  ;;  %vm453_vm6 = vcmp.eq.s32.totalorder %v1961_v14, %v2097_v35 }
  0x55   : > { %1494 = vmatmul.mubr.msk.f32.vlgmr.msra.gmra.mrb[0].mxu1 %vm539_vm4, %v2113_v36  ;;  %1591 = vmatpush1.bf16.msk.msra.mxu0 %vm1590_vm13, %v1810_v20  ;;  %vm1606_vm0 = vmpackc.low %vm445_vm9, %vm441_vm8  ;;  %vm456_vm8 = vcmp.eq.s32.totalorder %v1972_v19, %v2076_v32  ;;  %vm460_vm9 = vcmp.eq.s32.totalorder %v1996_v21, %v2076_v32 }
  0x56   : > { %1607 = vmatpush1.bf16.msk.msra.mxu1 %vm1606_vm0, %v1810_v20  ;;  %622 = vmatprep.mubr.f32.mxu0 %v1809_v1  ;;  %vm1592_vm3 = vmpackc.low %vm452_vm12, %vm448_vm11  ;;  %vm458_vm11 = vcmp.eq.s32.totalorder %v1972_v19, %v2083_v33  ;;  %vm462_vm12 = vcmp.eq.s32.totalorder %v1996_v21, %v2083_v33 }
  0x57   : > { %711 = vmatprep.mubr.f32.mxu1 %v1809_v1  ;;  %1593 = vmatprep.subr.msk.bf16.mxu0 %vm1592_vm3, %v1810_v20  ;;  %vm1608_vm7 = vmpackc.low %vm454_vm15, %vm450_vm14  ;;  %vm455_vm14 = vcmp.eq.s32.totalorder %v1972_v19, %v2090_v34  ;;  %vm459_vm15 = vcmp.eq.s32.totalorder %v1996_v21, %v2090_v34 }
  0x58   : > { %1475 = vmatmul.mubr.msk.f32.gmra.mrb[2].mxu0 %vm539_vm4, %v2142_v37  ;;  %1609 = vmatprep.subr.msk.bf16.mxu1 %vm1608_vm7, %v1810_v20  ;;  %vm1594_vm10 = vmpackc.low %vm451_vm2, %vm447_vm1  ;;  %vm457_vm1 = vcmp.eq.s32.totalorder %v1972_v19, %v2097_v35  ;;  %vm461_vm2 = vcmp.eq.s32.totalorder %v1996_v21, %v2097_v35 }
  0x59   : > { %1495 = vmatmul.mubr.msk.f32.gmra.mrb[2].mxu1 %vm539_vm4, %v2142_v37  ;;  %1595 = vmatpush1.bf16.msk.msra.mxu0 %vm1594_vm10, %v1810_v20  ;;  %vm1610_vm13 = vmpackc.low %vm453_vm6, %vm449_vm5  ;;  %vm464_vm5 = vcmp.eq.s32.totalorder %v2023_v25, %v2076_v32  ;;  %vm468_vm6 = vcmp.eq.s32.totalorder %v2035_v27, %v2076_v32 }
  0x5a   : > { %1611 = vmatpush1.bf16.msk.msra.mxu1 %vm1610_vm13, %v1810_v20  ;;  %628 = vmatprep.mubr.f32.mxu0 %v1809_v1  ;;  %vm1596_vm0 = vmpackc.low %vm460_vm9, %vm456_vm8  ;;  %vm466_vm8 = vcmp.eq.s32.totalorder %v2023_v25, %v2083_v33  ;;  %vm470_vm9 = vcmp.eq.s32.totalorder %v2035_v27, %v2083_v33 }
  0x5b   : > { %717 = vmatprep.mubr.f32.mxu1 %v1809_v1  ;;  %1597 = vmatprep.subr.msk.bf16.mxu0 %vm1596_vm0, %v1810_v20  ;;  %vm1612_vm3 = vmpackc.low %vm462_vm12, %vm458_vm11  ;;  %vm463_vm11 = vcmp.eq.s32.totalorder %v2023_v25, %v2090_v34  ;;  %vm467_vm12 = vcmp.eq.s32.totalorder %v2035_v27, %v2090_v34 }
  0x5c   : > { %1476 = vmatmul.mubr.msk.f32.gmra.mrb[4].mxu0 %vm539_vm4, %v537_v38  ;;  %1613 = vmatprep.subr.msk.bf16.mxu1 %vm1612_vm3, %v1810_v20  ;;  %vm1598_vm7 = vmpackc.low %vm459_vm15, %vm455_vm14  ;;  %vm465_vm14 = vcmp.eq.s32.totalorder %v2023_v25, %v2097_v35  ;;  %vm469_vm15 = vcmp.eq.s32.totalorder %v2035_v27, %v2097_v35  ;;  %vm1296_vm3 = vcmp.lt.s32.totalorder %v270_v0, 512 }
  0x5d   : > { %1496 = vmatmul.mubr.msk.f32.gmra.mrb[4].mxu1 %vm539_vm4, %v537_v38  ;;  %1599 = vmatpush1.bf16.msk.msra.mxu0 %vm1598_vm7, %v1810_v20  ;;  %vm1614_vm10 = vmpackc.low %vm461_vm2, %vm457_vm1 }
  0x5e   : > { %1615 = vmatpush1.bf16.msk.msra.mxu1 %vm1614_vm10, %v1810_v20  ;;  %634 = vmatprep.mubr.f32.mxu0 %v1809_v1  ;;  %vm1600_vm13 = vmpackc.low %vm468_vm6, %vm464_vm5 }
  0x5f   : > { %723 = vmatprep.mubr.f32.mxu1 %v1809_v1  ;;  %1601 = vmatprep.subr.msk.bf16.mxu0 %vm1600_vm13, %v1810_v20  ;;  %vm1616_vm0 = vmpackc.low %vm470_vm9, %vm466_vm8 }
  0x60   : > { %1477 = vmatmul.mubr.msk.f32.gmra.mrb[6].mxu0 %vm539_vm4, %v538_v39  ;;  %1617 = vmatprep.subr.msk.bf16.mxu1 %vm1616_vm0, %v1810_v20  ;;  %vm1602_vm1 = vmpackc.low %vm467_vm12, %vm463_vm11 }
  0x61   : > { %1497 = vmatmul.mubr.msk.f32.gmra.mrb[6].mxu1 %vm539_vm4, %v538_v39  ;;  %1603 = vmatpush1.bf16.msk.msra.mxu0 %vm1602_vm1, %v1810_v20  ;;  %vm1618_vm2 = vmpackc.low %vm469_vm15, %vm465_vm14 }
  0x62   : > { %1619 = vmatpush1.bf16.msk.msra.mxu1 %vm1618_vm2, %v1810_v20  ;;  %794 = vmatprep.mubr.f32.mxu0 %v1809_v1 }
  0x63   : > { %883 = vmatprep.mubr.f32.mxu1 %v1809_v1 }
  0x64   : > { %1514 = vmatmul.mubr.msk.f32.vlgmr.msra.gmra.mrb[8].mxu0 %vm539_vm4, %v2113_v36 }
  0x65   : > { %1534 = vmatmul.mubr.msk.f32.vlgmr.msra.gmra.mrb[8].mxu1 %vm539_vm4, %v2113_v36  ;;  %800 = vmatprep.mubr.f32.mxu0 %v1809_v1 }
  0x66   : > { %889 = vmatprep.mubr.f32.mxu1 %v1809_v1 }
  0x68   : > { %1515 = vmatmul.mubr.msk.f32.gmra.mrb[10].mxu0 %vm539_vm4, %v2142_v37 }
  0x69   : > { %1535 = vmatmul.mubr.msk.f32.gmra.mrb[10].mxu1 %vm539_vm4, %v2142_v37  ;;  %806 = vmatprep.mubr.f32.mxu0 %v1809_v1 }
  0x6a   : > { %895 = vmatprep.mubr.f32.mxu1 %v1809_v1 }
  0x6c   : > { %1516 = vmatmul.mubr.msk.f32.gmra.mrb[12].mxu0 %vm539_vm4, %v537_v38 }
  0x6d   : > { %1536 = vmatmul.mubr.msk.f32.gmra.mrb[12].mxu1 %vm539_vm4, %v537_v38  ;;  %812 = vmatprep.mubr.f32.mxu0 %v1809_v1 }
  0x6e   : > { %901 = vmatprep.mubr.f32.mxu1 %v1809_v1 }
  0x70   : > { %1517 = vmatmul.mubr.msk.f32.gmra.mrb[14].mxu0 %vm539_vm4, %v538_v39 }
  0x71   : > { %1537 = vmatmul.mubr.msk.f32.gmra.mrb[14].mxu1 %vm539_vm4, %v538_v39  ;;  %1029 = vmatprep.mubr.f32.mxu0 %v1809_v1  ;;  %vm952_vm4 = vcmask 261120  }
  0x72   : > { %1118 = vmatprep.mubr.f32.mxu1 %v1809_v1 }
  0xb8   : > { %v935_v48 = vpop.permute.xlu0 %934 }
 0x127   : > { %v618_v49 = vpop.f32.mrb[0].mxu0 }
 0x128   : > { %v707_v50 = vpop.f32.mrb[0].mxu1  ;;  %v620_v51 = vpop.f32.mrb[1].mxu0 }
 0x129   : > { %v709_v52 = vpop.f32.mrb[1].mxu1 }
 0x12b   : > { %v624_v53 = vpop.f32.mrb[2].mxu0 }
 0x12c   : > { %v713_v54 = vpop.f32.mrb[2].mxu1  ;;  %v626_v55 = vpop.f32.mrb[3].mxu0 }
 0x12d   : > { %v715_v56 = vpop.f32.mrb[3].mxu1 }
 0x12f   : > { %v630_v57 = vpop.f32.mrb[4].mxu0 }
 0x130   : > { %v719_v58 = vpop.f32.mrb[4].mxu1  ;;  %v632_v59 = vpop.f32.mrb[5].mxu0 }
 0x131   : > { %v721_v60 = vpop.f32.mrb[5].mxu1 }
 0x133   : > { %v636_v61 = vpop.f32.mrb[6].mxu0 }
 0x134   : > { %v725_v62 = vpop.f32.mrb[6].mxu1  ;;  %v638_v63 = vpop.f32.mrb[7].mxu0 }
 0x135   : > { %v727_v3 = vpop.f32.mrb[7].mxu1 }
 0x137   : > { %v796_v4 = vpop.f32.mrb[8].mxu0 }
 0x138   : > { %v908_v5 = vmul.f32 %v796_v4, %v618_v49  ;;  %v885_v6 = vpop.f32.mrb[8].mxu1  ;;  %v798_v7 = vpop.f32.mrb[9].mxu0 }
 0x139   : > { %v910_v8 = vmul.f32 %v885_v6, %v707_v50  ;;  %v909_v9 = vmul.f32 %v798_v7, %v620_v51  ;;  %v887_v10 = vpop.f32.mrb[9].mxu1  ;;  %v945_v49 = vpop.permute.xlu1 %944 }
 0x13a   : > { %v911_v11 = vmul.f32 %v887_v10, %v709_v52  ;;  %v940_v50 = vpop.permute.xlu0 %939 }
 0x13b   : > { %v802_v12 = vpop.f32.mrb[10].mxu0 }
 0x13c   : > { %v912_v13 = vmul.f32 %v802_v12, %v624_v53  ;;  %v891_v14 = vpop.f32.mrb[10].mxu1  ;;  %v804_v15 = vpop.f32.mrb[11].mxu0 }
 0x13d   : > { %v914_v16 = vmul.f32 %v891_v14, %v713_v54  ;;  %v913_v17 = vmul.f32 %v804_v15, %v626_v55  ;;  %v893_v18 = vpop.f32.mrb[11].mxu1  ;;  %v950_v55 = vpop.permute.xlu1 %949 }
 0x13e   : > { %v1622_v19 = vpack.c.bf16 %v912_v13, %v908_v5  ;;  %v915_v20 = vmul.f32 %v893_v18, %v715_v56  ;;  %v1166_v6 = vpop.permute.xlu0 %1165 }
 0x13f   : > { %v1630_v21 = vpack.c.bf16 %v914_v16, %v910_v8  ;;  %v1620_v22 = vpack.c.bf16 %v913_v17, %v909_v9  ;;  %v808_v23 = vpop.f32.mrb[12].mxu0 }
 0x140   : > { %v1628_v24 = vpack.c.bf16 %v915_v20, %v911_v11  ;;  %v916_v25 = vmul.f32 %v808_v23, %v630_v57  ;;  %v897_v26 = vpop.f32.mrb[12].mxu1  ;;  %v810_v27 = vpop.f32.mrb[13].mxu0 }
 0x141   : > { %v918_v28 = vmul.f32 %v897_v26, %v719_v58  ;;  %v917_v29 = vmul.f32 %v810_v27, %v632_v59  ;;  %v899_v30 = vpop.f32.mrb[13].mxu1  ;;  %1621 = vmatprep.subr.bf16.mxu0 %v1620_v22  ;;  %v1171_v17 = vpop.permute.xlu1 %1170 }
 0x142   : > { %v919_v31 = vmul.f32 %v899_v30, %v721_v60  ;;  %1629 = vmatprep.subr.bf16.mxu1 %v1628_v24  ;;  %1623 = vmatpush1.bf16.msra.mxu0 %v1622_v19 }
 0x143   : > { %1631 = vmatpush1.bf16.msra.mxu1 %v1630_v21  ;;  %v814_v32 = vpop.f32.mrb[14].mxu0 }
 0x144   : > { %v920_v33 = vmul.f32 %v814_v32, %v636_v61  ;;  %v903_v34 = vpop.f32.mrb[14].mxu1  ;;  %v816_v35 = vpop.f32.mrb[15].mxu0 }
 0x145   : > { %v922_v36 = vmul.f32 %v903_v34, %v725_v62  ;;  %v921_v37 = vmul.f32 %v816_v35, %v638_v63  ;;  %v905_v38 = vpop.f32.mrb[15].mxu1  ;;  %v1176_v34 = vpop.permute.xlu0 %1175 }
 0x146   : > { %v1626_v39 = vpack.c.bf16 %v920_v33, %v916_v25  ;;  %v923_v40 = vmul.f32 %v905_v38, %v727_v3 }
 0x147   : > { %v1634_v41 = vpack.c.bf16 %v922_v36, %v918_v28  ;;  %v1624_v42 = vpack.c.bf16 %v921_v37, %v917_v29 }
 0x148   : > { %v1632_v43 = vpack.c.bf16 %v923_v40, %v919_v31 }
 0x149   : > { %1625 = vmatprep.subr.bf16.mxu0 %v1624_v42 }
 0x14a   : > { %1633 = vmatprep.subr.bf16.mxu1 %v1632_v43  ;;  %1627 = vmatpush1.bf16.msra.mxu0 %v1626_v39 }
 0x14b   : > { %1635 = vmatpush1.bf16.msra.mxu1 %v1634_v41 }
 0x14d   : > { %1538 = vmatmul.mubr.msk.f32.vlgmr.msra.gmra.mrb[16].mxu0 %vm952_vm4, %v924_v44 }
 0x14e   : > { %1542 = vmatmul.mubr.msk.f32.vlgmr.msra.gmra.mrb[16].mxu1 %vm952_vm4, %v924_v44  ;;  %1035 = vmatprep.mubr.f32.mxu0 %v1809_v1 }
 0x14f   : > { %1124 = vmatprep.mubr.f32.mxu1 %v1809_v1 }
 0x151   : > { %1539 = vmatmul.mubr.msk.f32.gmra.mrb[18].mxu0 %vm952_vm4, %v925_v45 }
 0x152   : > { %1543 = vmatmul.mubr.msk.f32.gmra.mrb[18].mxu1 %vm952_vm4, %v925_v45  ;;  %1041 = vmatprep.mubr.f32.mxu0 %v1809_v1 }
 0x153   : > { %1130 = vmatprep.mubr.f32.mxu1 %v1809_v1 }
 0x155   : > { %1540 = vmatmul.mubr.msk.f32.gmra.mrb[20].mxu0 %vm952_vm4, %v926_v46 }
 0x156   : > { %1544 = vmatmul.mubr.msk.f32.gmra.mrb[20].mxu1 %vm952_vm4, %v926_v46  ;;  %1047 = vmatprep.mubr.f32.mxu0 %v1809_v1 }
 0x157   : > { %1136 = vmatprep.mubr.f32.mxu1 %v1809_v1 }
 0x159   : > { %1541 = vmatmul.mubr.msk.f32.gmra.mrb[22].mxu0 %vm952_vm4, %v927_v47 }
 0x15a   : > { %1545 = vmatmul.mubr.msk.f32.gmra.mrb[22].mxu1 %vm952_vm4, %v927_v47 }
 0x220   : > { %v1031_v51 = vpop.f32.mrb[16].mxu0 }
 0x221   : > { %v1032_v52 = vadd.f32 %v1031_v51, %v935_v48  ;;  %v1120_v53 = vpop.f32.mrb[16].mxu1  ;;  %v1033_v54 = vpop.f32.mrb[17].mxu0 }
 0x222   : > { %v1121_v56 = vadd.f32 %v1120_v53, %v935_v48  ;;  %v1034_v57 = vadd.f32 %v1033_v54, %v935_v48  ;;  %v1122_v58 = vpop.f32.mrb[17].mxu1 }
 0x223   : > { %v1143_v59 = vmax.f32 %v1032_v52, 0.0  ;;  %v1123_v60 = vadd.f32 %v1122_v58, %v935_v48  ;;  %v1181_v58 = vpop.permute.xlu1 %1180 }
 0x224   : > { %v1145_v61 = vmax.f32 %v1121_v56, 0.0  ;;  %v1144_v62 = vmax.f32 %v1034_v57, 0.0  ;;  %v1037_v1 = vpop.f32.mrb[18].mxu0 }
 0x225   : > { %v1146_v63 = vmax.f32 %v1123_v60, 0.0  ;;  %v1038_v3 = vadd.f32 %v1037_v1, %v940_v50  ;;  %v1126_v4 = vpop.f32.mrb[18].mxu1  ;;  %v1039_v5 = vpop.f32.mrb[19].mxu0  ;;  %v1183_v10 = vmul.f32 %v1166_v6, %v1143_v59 }
 0x226   : > { %v1127_v7 = vadd.f32 %v1126_v4, %v940_v50  ;;  %v1040_v8 = vadd.f32 %v1039_v5, %v940_v50  ;;  %v1128_v9 = vpop.f32.mrb[19].mxu1  ;;  %v1184_v13 = vmul.f32 %v1166_v6, %v1144_v62  ;;  %v1185_v14 = vmul.f32 %v1166_v6, %v1145_v61 }
 0x227   : > { %v1147_v11 = vmax.f32 %v1038_v3, 0.0  ;;  %v1129_v12 = vadd.f32 %v1128_v9, %v940_v50  ;;  %v1186_v19 = vmul.f32 %v1166_v6, %v1146_v63 }
 0x228   : > { %v1149_v15 = vmax.f32 %v1127_v7, 0.0  ;;  %v1148_v16 = vmax.f32 %v1040_v8, 0.0  ;;  %v1043_v18 = vpop.f32.mrb[20].mxu0 }
 0x229   : > { %v1150_v20 = vmax.f32 %v1129_v12, 0.0  ;;  %v1187_v21 = vmul.f32 %v1171_v17, %v1147_v11  ;;  %v1044_v22 = vadd.f32 %v1043_v18, %v945_v49  ;;  %v1132_v23 = vpop.f32.mrb[20].mxu1  ;;  %v1045_v24 = vpop.f32.mrb[21].mxu0 }
 0x22a   : > { %v1188_v25 = vmul.f32 %v1171_v17, %v1148_v16  ;;  %v1189_v26 = vmul.f32 %v1171_v17, %v1149_v15  ;;  %v1133_v27 = vadd.f32 %v1132_v23, %v945_v49  ;;  %v1046_v28 = vadd.f32 %v1045_v24, %v945_v49  ;;  %v1134_v29 = vpop.f32.mrb[21].mxu1 }
 0x22b   : > { %v1190_v30 = vmul.f32 %v1171_v17, %v1150_v20  ;;  %v1151_v31 = vmax.f32 %v1044_v22, 0.0  ;;  %v1199_v32 = vadd.f32 %v1187_v21, %v1183_v10  ;;  %v1135_v33 = vadd.f32 %v1134_v29, %v945_v49 }
 0x22c   : > { %v1153_v35 = vmax.f32 %v1133_v27, 0.0  ;;  %v1217_v36 = vadd.f32 %v1189_v26, %v1185_v14  ;;  %v1152_v37 = vmax.f32 %v1046_v28, 0.0  ;;  %v1208_v38 = vadd.f32 %v1188_v25, %v1184_v13  ;;  %v1049_v39 = vpop.f32.mrb[22].mxu0 }
 0x22d   : > { %v1191_v40 = vmul.f32 %v1176_v34, %v1151_v31  ;;  %v1154_v41 = vmax.f32 %v1135_v33, 0.0  ;;  %v1226_v42 = vadd.f32 %v1190_v30, %v1186_v19  ;;  %v1050_v43 = vadd.f32 %v1049_v39, %v950_v55  ;;  %v1138_v44 = vpop.f32.mrb[22].mxu1  ;;  %v1051_v45 = vpop.f32.mrb[23].mxu0 }
 0x22e   : > { %v1193_v46 = vmul.f32 %v1176_v34, %v1153_v35  ;;  %v1192_v47 = vmul.f32 %v1176_v34, %v1152_v37  ;;  %v1139_v48 = vadd.f32 %v1138_v44, %v950_v55  ;;  %v1052_v50 = vadd.f32 %v1051_v45, %v950_v55  ;;  %v1140_v51 = vpop.f32.mrb[23].mxu1 }
 0x22f   : > { %v1200_v52 = vadd.f32 %v1199_v32, %v1191_v40  ;;  %v1194_v53 = vmul.f32 %v1176_v34, %v1154_v41  ;;  %v1155_v49 = vmax.f32 %v1050_v43, 0.0  ;;  %v1141_v54 = vadd.f32 %v1140_v51, %v950_v55 }
 0x230   : > { %v1218_v56 = vadd.f32 %v1217_v36, %v1193_v46  ;;  %v1209_v57 = vadd.f32 %v1208_v38, %v1192_v47  ;;  %v1157_v59 = vmax.f32 %v1139_v48, 0.0  ;;  %v1156_v60 = vmax.f32 %v1052_v50, 0.0 }
 0x231   : > { %v1227_v61 = vadd.f32 %v1226_v42, %v1194_v53  ;;  %v1195_v62 = vmul.f32 %v1181_v58, %v1155_v49  ;;  %v1158_v1 = vmax.f32 %v1141_v54, 0.0  ;;  %v1236_v25 = vstv %s1235_s27 }
 0x232   : > { %v1197_v63 = vmul.f32 %v1181_v58, %v1157_v59  ;;  %v1196_v3 = vmul.f32 %v1181_v58, %v1156_v60  ;;  %v1812_v50 = vmov 1966171168  }
 0x233   : > { %v1201_v4 = vadd.f32 %v1200_v52, %v1195_v62  ;;  %v1198_v5 = vmul.f32 %v1181_v58, %v1158_v1  ;;  %v1272_v51 = vunpack.c.l.s4 %v1812_v50 }
 0x234   : > { %v1219_v6 = vadd.f32 %v1218_v56, %v1197_v63  ;;  %v1210_v7 = vadd.f32 %v1209_v57, %v1196_v3 }
 0x235   : > { %v1202_v8 = vrot.slane %v1201_v4, 4  ;;  %v1228_v9 = vadd.f32 %v1227_v61, %v1198_v5  ;;  %v1273_v52 = vunpack.c.0.s8 %v1272_v51 }
 0x236   : > { %v1220_v10 = vrot.slane %v1219_v6, 4  ;;  %v1211_v11 = vrot.slane %v1210_v7, 4 }
 0x237   : > { %v1203_v55 = vadd.f32 %v1202_v8, %v1201_v4  ;;  %v1229_v12 = vrot.slane %v1228_v9, 4  ;;  %v1276_v54 = vsub.s32 %v1273_v52, %v1939_v2 }
 0x238   : > { %v1221_v13 = vadd.f32 %v1220_v10, %v1219_v6  ;;  %v1212_v14 = vadd.f32 %v1211_v11, %v1210_v7 }
 0x239   : > { %v1204_v15 = vrot.slane %v1203_v55, 2  ;;  %v1230_v16 = vadd.f32 %v1229_v12, %v1228_v9 }
 0x23a   : > { %v1222_v17 = vrot.slane %v1221_v13, 2  ;;  %v1213_v18 = vrot.slane %v1212_v14, 2 }
 0x23b   : > { %v1205_v19 = vadd.f32 %v1204_v15, %v1203_v55  ;;  %v1231_v20 = vrot.slane %v1230_v16, 2 }
 0x23c   : > { %v1223_v21 = vadd.f32 %v1222_v17, %v1221_v13  ;;  %v1214_v22 = vadd.f32 %v1213_v18, %v1212_v14 }
 0x23d   : > { %v1206_v23 = vrot.slane %v1205_v19, 1  ;;  %v1232_v24 = vadd.f32 %v1231_v20, %v1230_v16 }
 0x23e   : > { %v1224_v26 = vrot.slane %v1223_v21, 1  ;;  %v1215_v27 = vrot.slane %v1214_v22, 1 }
 0x23f   : > { %v1207_v28 = vadd.f32 %v1206_v23, %v1205_v19  ;;  %v1233_v29 = vrot.slane %v1232_v24, 1 }
 0x240   : > { %v1225_v30 = vadd.f32 %v1224_v26, %v1223_v21  ;;  %v1216_v31 = vadd.f32 %v1215_v27, %v1214_v22 }
 0x241   : > { %v1237_v32 = vadd.f32 %v1236_v25, %v1207_v28  ;;  %v1234_v33 = vadd.f32 %v1233_v29, %v1232_v24 }
 0x242   : > { %v1239_v34 = vadd.f32 %v1236_v25, %v1225_v30  ;;  %v1238_v35 = vadd.f32 %v1236_v25, %v1216_v31 }
 0x243   : > { %v1546_v36 = vmul.f32 -1.442695, %v1237_v32  ;;  %v1240_v37 = vadd.f32 %v1236_v25, %v1234_v33 }
 0x244   : > { %v1548_v38 = vmul.f32 -1.442695, %v1239_v34  ;;  %v1547_v39 = vmul.f32 -1.442695, %v1238_v35 }
 0x245   : > { %1694 = vpow2.f32 %v1546_v36  ;;  %v1549_v40 = vmul.f32 -1.442695, %v1240_v37 }
 0x246   : > { %1696 = vpow2.f32 %v1548_v38 }
 0x247   : > { %1698 = vpow2.f32 %v1547_v39 }
 0x248   : > { %1700 = vpow2.f32 %v1549_v40 }
 0x24f   : > { %v1695_v41 = vpop.eup %1694 }
 0x250   : > { %v1697_v42 = vpop.eup %1696  ;;  %v1253_v43 = vadd.f32 1.0, %v1695_v41 }
 0x251   : > { %v1699_v44 = vpop.eup %1698  ;;  %v1255_v45 = vadd.f32 1.0, %v1697_v42 }
 0x252   : > { %v1701_v46 = vpop.eup %1700  ;;  %1702 = vrcp.f32 %v1253_v43  ;;  %v1254_v47 = vadd.f32 1.0, %v1699_v44 }
 0x253   : > { %1704 = vrcp.f32 %v1255_v45  ;;  %v1256_v48 = vadd.f32 1.0, %v1701_v46 }
 0x254   : > { %1706 = vrcp.f32 %v1254_v47 }
 0x255   : > { %1708 = vrcp.f32 %v1256_v48 }
 0x25c   : > { %v1703_v53 = vpop.eup %1702 }
 0x25d   : > { %v1705_v49 = vpop.eup %1704 }
 0x25e   : > { %v1707_v56 = vpop.eup %1706 }
 0x25f   : > { %v1709_v57 = vpop.eup %1708  ;;  %v1269_v58 = vcombine.low %v1703_v53, %v1707_v56 }
 0x260   : > { %v1270_v59 = vcombine.low %v1705_v49, %v1709_v57 }
 0x261   : > { %v1277_v60 = vrot.slane %v1269_v58, %v1276_v54 }
 0x262   : > { %v1284_v61 = vrot.slane %v1270_v59, %v1276_v54 }
 0x264   : > { %v1285_v62 = vcombine.low %v1277_v60, %v1284_v61 }
 0x266   : > { %v1292_v1 = vrot.slane %v1285_v62, %v1276_v54 }
 0x268   : > { %1298 = vst.msk [vmem:[%s261_s10] sm:$0xf] %vm1296_vm3, %v1292_v1 }
 0x269   : > { %1751 = shalt.err (!%p1748_p7)
}
 0x26a   : > { %s1752_s20 = scalar_lea.hbm %s2302_s15, 64  ;;  %s1756_s27 = scalar_lea.hbm %s2350_s6, 256 }
 0x26b   : > { %p1753_p8 = scmp.ne.s32.totalorder %s2302_s15, %s1752_s20  ;;  %p1757_p1 = scmp.lt.u32.totalorder %s2302_s15, %s2350_s6 }
 0x26c   : > { %p1758_p0 = scmp.lt.u32.totalorder %s1756_s27, %s1752_s20  ;;  %p1760_p6 = scmp.lt.u32.totalorder %s1752_s20, %s2302_s15 }
 0x26d   : > { %p1754_p11 = pnand %p1753_p8, %p2361_p9 }
 0x26e   : > { %p1759_p5 = por %p1758_p0, %p1757_p1 }
 0x26f   : > { %p1755_p13 = pneg %p1754_p11 }
 0x270   : > { %p1761_p10 = por %p1760_p6, %p1759_p5 }
 0x272   : > { %p1762_p12 = pnand %p1761_p10, %p1755_p13 }
 0x274   : > { %1765 = shalt.err (!%p1762_p12)
}
 0x275   : > { %1640 = dma.vmem_to_hbm [thread:$0]  (%p2361_p9), %s2304_s12, 64, %s2302_s15, %s1300_s16  }
 0x276 PF: > { %p1652_p2 = scmp.ge.s32.totalorder %s1804_s26, 2  ;;  %s1326_s11 = sand.u32 1, %s1792_s23  }
 0x277   : > { %p2362_p3 = scmp.ne.s32.totalorder %s2355_s9, 0  ;;  %s1327_s10 = scalar_lea.sflag [#allocation5], %s1326_s11 }
 0x279   : > { %p1647_p4 = pnand %p1652_p2, %p2362_p3 }
 0x27b   : > { %1787 = dma.done.wait (!%p1647_p4), %s1327_s10, 64  }
 0x27c   : > { %1789 = vsyncadd (!%p1647_p4), %s1327_s10, 4294967232  ;;  %p18_p7 = scmp.ge.s32.totalorder %s1877_s28, 6   ;;  %s2363_s23 = smov %s1796_s24 }
 0x27d   : > { %s2364_s24 = smov %s1800_s25  ;;  %s2365_s25 = smov %s1888_s7 }
 0x27e   : > { %s2366_s26 = smov %s1877_s28  ;;  %20 = sbr.rel (!%p18_p7) target bundleno = 6 (0x6), region = 84 }
 0x285   :  { %1332 = vsyncpa [#allocation4], 1 }
 0x286   :  { %1334 = vsyncpa [#allocation4 + $0x1], 1 }
 0x287   :  { %1335 = vsyncpa [#allocation5], 1 }
 0x288   :  { %1337 = vsyncpa [#allocation5 + $0x1], 1 }

</bundles_post_ra>
